<compile_context>
chip_gen: v7x
topology: tpu7x:2x2x1
jax: 0.10.0
libtpu: 0.0.40
codegen_flags: <defaults>
</compile_context>

<pallas_src>
import jax
import jax.numpy as jnp
from jax.experimental import pallas as pl
from jax.experimental.pallas import tpu as pltpu


EPS = 1e-5


def _make_mlp_kernel(in_p, W):
    """Build the fused MLP kernel with static slab-slice offsets baked in."""

    def kernel(x_ref, w_ref, rows_ref, o_ref):
        # Packed parameter rows: one [8, W] slab, statically indexed.
        rows = rows_ref[...]
        g0, be0 = rows[0:1, :], rows[1:2, :]
        g1, be1 = rows[2:3, :], rows[3:4, :]
        b2, bound = rows[4:5, :], rows[5:6, :]

        inv_b = jnp.float32(1.0 / x_ref.shape[0])

        def bn_relu(h, g, be):
            # Training-mode BatchNorm1d batch stats, single pass (sum & sum-of-squares),
            # then one fused scale/shift.  Linear bias omitted upstream: a per-column
            # constant is exactly cancelled by the mean subtraction.
            mu = jnp.sum(h, axis=0, keepdims=True) * inv_b
            ex2 = jnp.sum(h * h, axis=0, keepdims=True) * inv_b
            var = ex2 - mu * mu                      # biased variance (PyTorch fwd)
            scale = g * jax.lax.rsqrt(var + EPS)     # EUP rsqrt (free slot)
            shift = be - mu * scale
            return jnp.maximum(h * scale + shift, 0.0)

        # Static, sublane-aligned ref slices of the single packed weight slab.
        w0 = w_ref[0:in_p, :]
        w1 = w_ref[in_p:in_p + W, :]
        w2 = w_ref[in_p + W:in_p + 2 * W, :]

        # layer 0: Linear(no bias needed) -> BN -> ReLU
        h = jnp.dot(x_ref[...], w0, preferred_element_type=jnp.float32)
        h = bn_relu(h, g0, be0)

        # layer 1: Linear(no bias needed) -> BN -> ReLU
        h = jnp.dot(h, w1, preferred_element_type=jnp.float32)
        h = bn_relu(h, g1, be1)

        # layer 2 (last): Linear -> Tanh, then scale by bound.  Padded lanes stay 0.
        y = jnp.tanh(jnp.dot(h, w2, preferred_element_type=jnp.float32) + b2)
        o_ref[...] = (y * bound).astype(o_ref.dtype)

    return kernel


def _round_up(n, m):
    return ((n + m - 1) // m) * m


def neuron_network_forward(x, params, bound):
    """Fused forward pass. x: [B, input_size] float32. Returns [B, output_size]."""
    (w0, b0, g0, be0, w1, b1, g1, be1, w2, b2) = params
    # b0/b1 are mathematically dead: BatchNorm's batch-mean subtraction cancels any
    # per-feature constant added by the preceding Linear.  Don't ship them.
    del b0, b1

    B, in_size = x.shape
    h0, h1, out_size = w0.shape[1], w1.shape[1], w2.shape[1]
    W = _round_up(max(h0, h1, out_size), 128)   # lane-dense padded feature width
    in_p = _round_up(in_size, 8)                # sublane-aligned padded input width

    def pad_cols(a, width, fill=0.0):
        return jnp.pad(a, ((0, 0), (0, width - a.shape[1])), constant_values=fill)

    # Zero-padded weights: padded columns/rows contribute exactly 0, so padded output
    # lanes stay 0 through BN/ReLU/Tanh and are sliced off at the end.  All three
    # weights are stacked into one [in_p + 2W, W] slab -> a single DMA.
    xp = pad_cols(x, in_p)
    w0p = jnp.pad(w0, ((0, in_p - in_size), (0, W - h0)))    # [in_p, W]
    w1p = jnp.pad(w1, ((0, W - h0), (0, W - h1)))            # [W,   W]
    w2p = jnp.pad(w2, ((0, W - h1), (0, W - out_size)))      # [W,   W]
    w_slab = jnp.concatenate([w0p, w1p, w2p], axis=0)        # [in_p + 2W, W]

    # Pack every [1, F] row vector into a single [8, W] slab -> one DMA, one vreg tile.
    rows = jnp.concatenate(
        [
            pad_cols(g0, W, 1.0), pad_cols(be0, W),
            pad_cols(g1, W, 1.0), pad_cols(be1, W),
            pad_cols(b2, W), pad_cols(bound.reshape(1, out_size), W),
            jnp.zeros((2, W), jnp.float32),
        ],
        axis=0,
    )

    vmem = pl.BlockSpec(memory_space=pltpu.MemorySpace.VMEM)
    flops = 2 * B * (in_size * h0 + h0 * h1 + h1 * out_size)
    bytes_accessed = 4 * (xp.size + w_slab.size + rows.size + B * W)

    out_padded = pl.pallas_call(
        _make_mlp_kernel(in_p, W),
        out_shape=jax.ShapeDtypeStruct((B, W), jnp.float32),
        in_specs=[vmem, vmem, vmem],
        out_specs=vmem,
        cost_estimate=pl.CostEstimate(
            flops=flops,
            transcendentals=B * out_size + 2 * max(h0, h1),
            bytes_accessed=bytes_accessed,
        ),
    )(xp, w_slab, rows)

    return out_padded[:, :out_size]


def init_params(key, input_size, output_size, hidden_sizes):
    """Deterministic init mirroring NeuronNetwork.__init__ / init_weights.

    Linear weights: kaiming_uniform_(nonlinearity='relu') -> U(-sqrt(6/fan_in), +sqrt(6/fan_in)),
    stored transposed as [in, out].  Linear bias: 0.01.  BatchNorm: gamma=1, beta=0.
    As in the PyTorch module, hidden_sizes[-1] is never used as an output dim.
    """
    layer = len(hidden_sizes)
    dims = []
    for i in range(layer):
        if i == 0:
            dims.append((input_size, hidden_sizes[0], True))          # (in, out, has_bn)
        elif i == layer - 1:
            dims.append((hidden_sizes[i - 1], output_size, False))
        else:
            dims.append((hidden_sizes[i - 1], hidden_sizes[i], True))

    params = []
    for (fan_in, fan_out, has_bn) in dims:
        key, sub = jax.random.split(key)
        limit = jnp.sqrt(6.0 / fan_in)  # kaiming_uniform with relu gain
        w = jax.random.uniform(sub, (fan_in, fan_out), jnp.float32, -limit, limit)
        b = jnp.full((1, fan_out), 0.01, jnp.float32)
        params.extend([w, b])
        if has_bn:
            params.extend([jnp.ones((1, fan_out), jnp.float32),
                           jnp.zeros((1, fan_out), jnp.float32)])

    assert output_size % 2 == 0, "output_size must be even (bound tile of [1.0, 0.8])"
    bound = jnp.tile(jnp.array([1.0, 0.8], jnp.float32), output_size // 2)
    bound = bound.reshape(1, output_size)
    return tuple(params), bound


def reference_forward(x, params, bound):
    """Pure-JAX reference (keeps the biases and the textbook BN formulation)."""
    (w0, b0, g0, be0, w1, b1, g1, be1, w2, b2) = params

    def lin_bn_relu(h, w, b, g, be):
        h = h @ w + b
        mu = jnp.mean(h, axis=0, keepdims=True)
        var = jnp.mean((h - mu) ** 2, axis=0, keepdims=True)
        h = (h - mu) / jnp.sqrt(var + EPS) * g + be
        return jnp.maximum(h, 0.0)

    h = lin_bn_relu(x, w0, b0, g0, be0)
    h = lin_bn_relu(h, w1, b1, g1, be1)
    y = jnp.tanh(h @ w2 + b2)
    return y * bound


if __name__ == "__main__":
    # Small shapes consistent with the module's forward: x is [batch, input_size].
    batch = 8
    input_size = 16
    hidden_sizes = [32, 32, 32]   # last entry unused as an output dim (matches PyTorch module)
    output_size = 4               # must be even

    key = jax.random.PRNGKey(0)
    key, xkey = jax.random.split(key)
    x = jax.random.normal(xkey, (batch, input_size), dtype=jnp.float32)

    params, bound = init_params(key, input_size, output_size, hidden_sizes)

    out = neuron_network_forward(x, params, bound)
    out = jax.block_until_ready(out)

    ref = reference_forward(x, params, bound)
    assert out.shape == (batch, output_size)
    assert jnp.allclose(out, ref, atol=3e-5, rtol=3e-5), "Pallas output mismatch vs JAX reference"

    print("KERNEL_OK")
</pallas_src>

<mosaic_0001>
module attributes {stable_mosaic.version = 11 : i64} {
  func.func @kernel(%arg0: memref<8x16xf32, #tpu.memory_space<vmem>>, %arg1: memref<272x128xf32, #tpu.memory_space<vmem>>, %arg2: memref<8x128xf32, #tpu.memory_space<vmem>>, %arg3: memref<8x128xf32, #tpu.memory_space<vmem>>) attributes {dimension_semantics = [], scalar_prefetch = 0 : i64, scratch_operands = 0 : i64, tpu.core_type = #tpu.core_type<tc>} {
    %c0 = arith.constant 0 : index
    %c0_0 = arith.constant 0 : index
    %0 = vector.load %arg2[%c0, %c0_0] : memref<8x128xf32, #tpu.memory_space<vmem>>, vector<8x128xf32>
    %1 = vector.extract_strided_slice %0 {offsets = [0, 0], sizes = [1, 128], strides = [1, 1]} : vector<8x128xf32> to vector<1x128xf32>
    %2 = vector.extract_strided_slice %0 {offsets = [1, 0], sizes = [1, 128], strides = [1, 1]} : vector<8x128xf32> to vector<1x128xf32>
    %3 = vector.extract_strided_slice %0 {offsets = [2, 0], sizes = [1, 128], strides = [1, 1]} : vector<8x128xf32> to vector<1x128xf32>
    %4 = vector.extract_strided_slice %0 {offsets = [3, 0], sizes = [1, 128], strides = [1, 1]} : vector<8x128xf32> to vector<1x128xf32>
    %5 = vector.extract_strided_slice %0 {offsets = [4, 0], sizes = [1, 128], strides = [1, 1]} : vector<8x128xf32> to vector<1x128xf32>
    %6 = vector.extract_strided_slice %0 {offsets = [5, 0], sizes = [1, 128], strides = [1, 1]} : vector<8x128xf32> to vector<1x128xf32>
    %c0_1 = arith.constant 0 : index
    %c0_2 = arith.constant 0 : index
    %7 = vector.load %arg1[%c0_1, %c0_2] : memref<272x128xf32, #tpu.memory_space<vmem>>, vector<16x128xf32>
    %c16 = arith.constant 16 : index
    %c0_3 = arith.constant 0 : index
    %8 = vector.load %arg1[%c16, %c0_3] : memref<272x128xf32, #tpu.memory_space<vmem>>, vector<128x128xf32>
    %c144 = arith.constant 144 : index
    %c0_4 = arith.constant 0 : index
    %9 = vector.load %arg1[%c144, %c0_4] : memref<272x128xf32, #tpu.memory_space<vmem>>, vector<128x128xf32>
    %c0_5 = arith.constant 0 : index
    %c0_6 = arith.constant 0 : index
    %10 = vector.load %arg0[%c0_5, %c0_6] : memref<8x16xf32, #tpu.memory_space<vmem>>, vector<8x16xf32>
    %cst = arith.constant dense<0.000000e+00> : vector<8x128xf32>
    %11 = tpu.matmul %10, %7, %cst {dimension_numbers = #tpu.dot_dimension_numbers<[1], [0], [0], [1], [0, 0, 1, 1], [], []>} : vector<8x16xf32>, vector<16x128xf32>, vector<8x128xf32> -> vector<8x128xf32>
    %cst_7 = arith.constant dense<0.000000e+00> : vector<128xf32>
    %12 = vector.multi_reduction <add>, %11, %cst_7 [0] : vector<8x128xf32> to vector<128xf32>
    %13 = vector.shape_cast %12 : vector<128xf32> to vector<1x128xf32>
    %cst_8 = arith.constant 1.250000e-01 : f32
    %14 = vector.broadcast %cst_8 : f32 to vector<1x128xf32>
    %15 = arith.mulf %13, %14 : vector<1x128xf32>
    %16 = arith.mulf %11, %11 : vector<8x128xf32>
    %cst_9 = arith.constant dense<0.000000e+00> : vector<128xf32>
    %17 = vector.multi_reduction <add>, %16, %cst_9 [0] : vector<8x128xf32> to vector<128xf32>
    %18 = vector.shape_cast %17 : vector<128xf32> to vector<1x128xf32>
    %cst_10 = arith.constant 1.250000e-01 : f32
    %19 = vector.broadcast %cst_10 : f32 to vector<1x128xf32>
    %20 = arith.mulf %18, %19 : vector<1x128xf32>
    %21 = arith.mulf %15, %15 : vector<1x128xf32>
    %22 = arith.subf %20, %21 : vector<1x128xf32>
    %cst_11 = arith.constant 9.99999974E-6 : f32
    %23 = vector.broadcast %cst_11 : f32 to vector<1x128xf32>
    %24 = arith.addf %22, %23 : vector<1x128xf32>
    %25 = math.rsqrt %24 : vector<1x128xf32>
    %26 = arith.mulf %1, %25 : vector<1x128xf32>
    %27 = arith.mulf %15, %26 : vector<1x128xf32>
    %28 = arith.subf %2, %27 : vector<1x128xf32>
    %29 = vector.broadcast %26 : vector<1x128xf32> to vector<8x128xf32>
    %30 = arith.mulf %11, %29 : vector<8x128xf32>
    %31 = vector.broadcast %28 : vector<1x128xf32> to vector<8x128xf32>
    %32 = arith.addf %30, %31 : vector<8x128xf32>
    %cst_12 = arith.constant 0.000000e+00 : f32
    %33 = vector.broadcast %cst_12 : f32 to vector<8x128xf32>
    %34 = arith.maximumf %32, %33 : vector<8x128xf32>
    %cst_13 = arith.constant dense<0.000000e+00> : vector<8x128xf32>
    %35 = tpu.matmul %34, %8, %cst_13 {dimension_numbers = #tpu.dot_dimension_numbers<[1], [0], [0], [1], [0, 0, 1, 1], [], []>} : vector<8x128xf32>, vector<128x128xf32>, vector<8x128xf32> -> vector<8x128xf32>
    %cst_14 = arith.constant dense<0.000000e+00> : vector<128xf32>
    %36 = vector.multi_reduction <add>, %35, %cst_14 [0] : vector<8x128xf32> to vector<128xf32>
    %37 = vector.shape_cast %36 : vector<128xf32> to vector<1x128xf32>
    %cst_15 = arith.constant 1.250000e-01 : f32
    %38 = vector.broadcast %cst_15 : f32 to vector<1x128xf32>
    %39 = arith.mulf %37, %38 : vector<1x128xf32>
    %40 = arith.mulf %35, %35 : vector<8x128xf32>
    %cst_16 = arith.constant dense<0.000000e+00> : vector<128xf32>
    %41 = vector.multi_reduction <add>, %40, %cst_16 [0] : vector<8x128xf32> to vector<128xf32>
    %42 = vector.shape_cast %41 : vector<128xf32> to vector<1x128xf32>
    %cst_17 = arith.constant 1.250000e-01 : f32
    %43 = vector.broadcast %cst_17 : f32 to vector<1x128xf32>
    %44 = arith.mulf %42, %43 : vector<1x128xf32>
    %45 = arith.mulf %39, %39 : vector<1x128xf32>
    %46 = arith.subf %44, %45 : vector<1x128xf32>
    %cst_18 = arith.constant 9.99999974E-6 : f32
    %47 = vector.broadcast %cst_18 : f32 to vector<1x128xf32>
    %48 = arith.addf %46, %47 : vector<1x128xf32>
    %49 = math.rsqrt %48 : vector<1x128xf32>
    %50 = arith.mulf %3, %49 : vector<1x128xf32>
    %51 = arith.mulf %39, %50 : vector<1x128xf32>
    %52 = arith.subf %4, %51 : vector<1x128xf32>
    %53 = vector.broadcast %50 : vector<1x128xf32> to vector<8x128xf32>
    %54 = arith.mulf %35, %53 : vector<8x128xf32>
    %55 = vector.broadcast %52 : vector<1x128xf32> to vector<8x128xf32>
    %56 = arith.addf %54, %55 : vector<8x128xf32>
    %cst_19 = arith.constant 0.000000e+00 : f32
    %57 = vector.broadcast %cst_19 : f32 to vector<8x128xf32>
    %58 = arith.maximumf %56, %57 : vector<8x128xf32>
    %cst_20 = arith.constant dense<0.000000e+00> : vector<8x128xf32>
    %59 = tpu.matmul %58, %9, %cst_20 {dimension_numbers = #tpu.dot_dimension_numbers<[1], [0], [0], [1], [0, 0, 1, 1], [], []>} : vector<8x128xf32>, vector<128x128xf32>, vector<8x128xf32> -> vector<8x128xf32>
    %60 = vector.broadcast %5 : vector<1x128xf32> to vector<8x128xf32>
    %61 = arith.addf %59, %60 : vector<8x128xf32>
    %62 = math.tanh %61 : vector<8x128xf32>
    %63 = vector.broadcast %6 : vector<1x128xf32> to vector<8x128xf32>
    %64 = arith.mulf %62, %63 : vector<8x128xf32>
    %c0_21 = arith.constant 0 : index
    %c0_22 = arith.constant 0 : index
    %65 = vector.load %arg3[%c0_21, %c0_22] : memref<8x128xf32, #tpu.memory_space<vmem>>, vector<8x128xf32>
    tpu.vector_store %arg3[%c0_21, %c0_22], %64 {strides = array<i32>} : memref<8x128xf32, #tpu.memory_space<vmem>>, vector<8x128xf32>,
    return
  }
}

</mosaic_0001>

<bundles_post_ra>
// kernel: tpu_custom_call.1
= control target key start
LH: loop header
LB: loop body
LE: loop exit
PB: predicated region body
PF: predicated region fallthrough
CT: control target
= control target key end

     0   :  { %8 = vsyncpa [#allocation3], 0  ;;  %s786_s0 = inlined_call_operand.hbm [shape: f32[8,16], index: 0, kind: input, shape index: {}]   ;;  %s787_s1 = inlined_call_operand.hbm [shape: f32[272,128], index: 1, kind: input, shape index: {}]   ;;  %s788_s2 = inlined_call_operand.hbm [shape: f32[8,128], index: 2, kind: input, shape index: {}]   ;;  %s789_s3 = inlined_call_operand.hbm [shape: f32[8,128], index: 3, kind: output, shape index: {}]  }
   0x1   :  { %9 = vsyncpa [#allocation6], 0 }
   0x2   :  { %10 = vsyncpa [#allocation4], 0  ;;  %s676_s12 = smov [#allocation5]   ;;  %s582_s16 = scalar_lea.hbm %s787_s1, 4352 }
   0x3   :  { %s26_s13 = sshll.u32 %s676_s12, 4  ;;  %p583_p0 = scmp.ne.s32.totalorder %s787_s1, %s582_s16  ;;  %s27_s13 = int_to_ptr.vmem [resolvable:$true] %s26_s13 }
   0x4   :  { %p586_p1 = scmp.lt.u32.totalorder %s582_s16, %s787_s1 }
   0x6   :  { %p588_p2 = pnand %p586_p1, %p583_p0 }
   0x8   :  { %591 = shalt.err (!%p588_p2)
}
   0x9   :  { %s592_s21 = scalar_lea.vmem %s27_s13, 4352  ;;  %p597_p4 = scmp.lt.s32.totalorder %s27_s13, %s27_s13 }
   0xa   :  { %p593_p3 = scmp.ne.s32.totalorder %s27_s13, %s592_s21  ;;  %p598_p5 = scmp.lt.s32.totalorder %s592_s21, %s592_s21 }
   0xc   :  { %p599_p6 = por %p598_p5, %p597_p4 }
   0xe   :  { %p600_p7 = pnand %p599_p6, %p593_p3 }
  0x10   :  { %603 = shalt.err (!%p600_p7)
}
  0x11   :  { %s677_s22 = smov 128   ;;  %s678_s23 = smov 8  }
  0x12   :  { %32 = dma.hbm_to_vmem [thread:$0]  %s787_s1, 4352, %s27_s13, [#allocation6], %s677_s22, %s677_s22, %s678_s23  }
  0x13   :  { %s679_s26 = smov [#allocation2]   ;;  %s680_s28 = smov [#allocation7]  }
  0x14   :  { %s17_s27 = sshll.u32 %s679_s26, 4  ;;  %s39_s29 = sshll.u32 %s680_s28, 4  ;;  %s18_s27 = int_to_ptr.vmem [resolvable:$true] %s17_s27  ;;  %s40_s29 = int_to_ptr.vmem [resolvable:$true] %s39_s29 }
  0x15   :  { %s604_s5 = scalar_lea.hbm %s786_s0, 128 }
  0x16   :  { %p605_p8 = scmp.ne.s32.totalorder %s786_s0, %s604_s5  ;;  %p608_p9 = scmp.lt.u32.totalorder %s604_s5, %s786_s0 }
  0x18   :  { %p610_p10 = pnand %p608_p9, %p605_p8 }
  0x1a   :  { %613 = shalt.err (!%p610_p10)
}
  0x1b   :  { %s614_s1 = scalar_lea.vmem %s18_s27, 128  ;;  %p619_p12 = scmp.lt.s32.totalorder %s18_s27, %s18_s27 }
  0x1c   :  { %p615_p11 = scmp.ne.s32.totalorder %s18_s27, %s614_s1  ;;  %p620_p13 = scmp.lt.s32.totalorder %s614_s1, %s614_s1 }
  0x1e   :  { %p621_p0 = por %p620_p13, %p619_p12 }
  0x20   :  { %p622_p1 = pnand %p621_p0, %p615_p11 }
  0x22   :  { %625 = shalt.err (!%p622_p1)
}
  0x23   :  { %20 = dma.hbm_to_vmem [thread:$0]  %s786_s0, 128, %s18_s27, [#allocation3]  }
  0x24   :  { %s626_s14 = scalar_lea.hbm %s788_s2, 128 }
  0x25   :  { %p627_p2 = scmp.ne.s32.totalorder %s788_s2, %s626_s14  ;;  %p630_p3 = scmp.lt.u32.totalorder %s626_s14, %s788_s2 }
  0x27   :  { %p632_p4 = pnand %p630_p3, %p627_p2 }
  0x29   :  { %635 = shalt.err (!%p632_p4)
}
  0x2a   :  { %s636_s19 = scalar_lea.vmem %s40_s29, 128  ;;  %p641_p6 = scmp.lt.s32.totalorder %s40_s29, %s40_s29 }
  0x2b   :  { %p637_p5 = scmp.ne.s32.totalorder %s40_s29, %s636_s19  ;;  %p642_p7 = scmp.lt.s32.totalorder %s636_s19, %s636_s19 }
  0x2d   :  { %p643_p8 = por %p642_p7, %p641_p6 }
  0x2f   :  { %p644_p9 = pnand %p643_p8, %p637_p5 }
  0x31   :  { %647 = shalt.err (!%p644_p9)
}
  0x32   :  { %42 = dma.hbm_to_vmem [thread:$0]  %s788_s2, 128, %s40_s29, [#allocation6]  }
  0x33   :  { %670 = dma.done.wait [#allocation3], 128  }
  0x34   :  { %671 = vsyncadd [#allocation3], 4294967168 }
  0x35   :  { %672 = dma.done.wait [#allocation6], 4480  }
  0x36   :  { %673 = vsyncadd [#allocation6], 4294962816  ;;  %v681_v0 = vmov 0.0|0.0   ;;  %vm682_vm0 = vmmov 0   ;;  %v683_v1 = vmov 0.0   ;;  %v53_v2 = vld [vmem:[#allocation5] sm:$0xff]  ;;  %v187_v50 = vlaneseq }
  0x37   :  { %516 = vmatprep.subr.bf16.mxu0 %v681_v0  ;;  %443 = vmatprep.mubr.msk.f32.mxu0 %vm682_vm0, %v683_v1  ;;  %v54_v3 = vld [vmem:[#allocation5 + $0x8] sm:$0xff]  ;;  %v87_v5 = vld [vmem:[#allocation2] sm:$0xff]  ;;  %vm88_vm1 = vcmask 130048   ;;  %v55_v6 = vld [vmem:[#allocation5 + $0x10] sm:$0xff]  ;;  %s684_s2 = smov [#allocation8]  }
  0x38   :  { %519 = vmatprep.subr.bf16.mxu1 %v681_v0  ;;  %478 = vmatprep.mubr.msk.f32.mxu1 %vm682_vm0, %v683_v1  ;;  %v517_v4 = vpack.c.bf16 %v54_v3, %v53_v2  ;;  %v56_v7 = vld [vmem:[#allocation5 + $0x18] sm:$0xff]  ;;  %v57_v9 = vld [vmem:[#allocation5 + $0x20] sm:$0xff]  ;;  %v58_v10 = vld [vmem:[#allocation5 + $0x28] sm:$0xff]  ;;  %v751_v51 = vshrl.u32 %v187_v50, 7  ;;  %s391_s21 = sshll.u32 %s684_s2, 4  ;;  %s392_s21 = int_to_ptr.vmem [resolvable:$true] %s391_s21 }
  0x39   :  { %v520_v8 = vpack.c.bf16 %v56_v7, %v55_v6  ;;  %v523_v11 = vpack.c.bf16 %v58_v10, %v57_v9  ;;  %v59_v12 = vld [vmem:[#allocation5 + $0x30] sm:$0xff]  ;;  %v60_v13 = vld [vmem:[#allocation5 + $0x38] sm:$0xff]  ;;  %v61_v15 = vld [vmem:[#allocation5 + $0x40] sm:$0xff]  ;;  %s648_s22 = scalar_lea.vmem %s392_s21, 128  ;;  %p653_p11 = scmp.lt.s32.totalorder %s392_s21, %s392_s21 }
  0x3a   :  { %518 = vmatpush3.bf16.msra.mxu0 %v517_v4  ;;  %v526_v14 = vpack.c.bf16 %v60_v13, %v59_v12  ;;  %v62_v16 = vld [vmem:[#allocation5 + $0x48] sm:$0xff]  ;;  %v63_v18 = vld [vmem:[#allocation5 + $0x50] sm:$0xff]  ;;  %v64_v19 = vld [vmem:[#allocation5 + $0x58] sm:$0xff]  ;;  %v189_v55 = vsub.s32 0, %v751_v51  ;;  %v194_v59 = vsub.s32 1, %v751_v51  ;;  %p649_p10 = scmp.ne.s32.totalorder %s392_s21, %s648_s22  ;;  %p654_p12 = scmp.lt.s32.totalorder %s648_s22, %s648_s22 }
  0x3b   :  { %543 = vmatprep.subr.bf16.mxu0 %v681_v0  ;;  %521 = vmatpush3.bf16.msra.mxu1 %v520_v8  ;;  %v529_v17 = vpack.c.bf16 %v62_v16, %v61_v15  ;;  %v532_v20 = vpack.c.bf16 %v64_v19, %v63_v18  ;;  %v65_v21 = vld [vmem:[#allocation5 + $0x60] sm:$0xff]  ;;  %v66_v22 = vld [vmem:[#allocation5 + $0x68] sm:$0xff]  ;;  %v67_v24 = vld [vmem:[#allocation5 + $0x70] sm:$0xff] }
  0x3c   :  { %522 = vmatprep.subr.bf16.mxu1 %v681_v0  ;;  %v535_v23 = vpack.c.bf16 %v66_v22, %v65_v21  ;;  %v68_v25 = vld [vmem:[#allocation5 + $0x78] sm:$0xff]  ;;  %v69_v26 = vld [vmem:[#allocation5 + $0x80] sm:$0xff]  ;;  %v70_v28 = vld [vmem:[#allocation5 + $0x88] sm:$0xff]  ;;  %p655_p13 = por %p654_p12, %p653_p11 }
  0x3d   :  { %444 = vmatmul.mubr.msk.f32.vlgmr.msra.gmra.mrb[0].mxu0 %vm88_vm1, %v87_v5  ;;  %v538_v27 = vpack.c.bf16 %v68_v25, %v67_v24  ;;  %v541_v29 = vpack.c.bf16 %v70_v28, %v69_v26  ;;  %v753_v52 = vld [vmem:[#allocation7] sm:$0xff]  ;;  %v72_v3 = vld [vmem:[#allocation5 + $0x98] sm:$0xff]  ;;  %v73_v5 = vld [vmem:[#allocation5 + $0xa0] sm:$0xff] }
  0x3e   :  { %513 = vmatprep.mubr.msk.f32.mxu0 %vm682_vm0, %v683_v1  ;;  %v71_v2 = vld [vmem:[#allocation5 + $0x90] sm:$0xff]  ;;  %v74_v6 = vld [vmem:[#allocation5 + $0xa8] sm:$0xff]  ;;  %v76_v9 = vld [vmem:[#allocation5 + $0xb8] sm:$0xff]  ;;  %p656_p0 = pnand %p655_p13, %p649_p10 }
  0x3f   :  { %524 = vmatpush3.bf16.msra.mxu1 %v523_v11  ;;  %v544_v4 = vpack.c.bf16 %v72_v3, %v71_v2  ;;  %v547_v7 = vpack.c.bf16 %v74_v6, %v73_v5  ;;  %v75_v8 = vld [vmem:[#allocation5 + $0xb0] sm:$0xff]  ;;  %v77_v11 = vld [vmem:[#allocation5 + $0xc0] sm:$0xff]  ;;  %v78_v12 = vld [vmem:[#allocation5 + $0xc8] sm:$0xff] }
  0x40   :  { %525 = vmatprep.subr.bf16.mxu1 %v681_v0  ;;  %v550_v10 = vpack.c.bf16 %v76_v9, %v75_v8  ;;  %v553_v13 = vpack.c.bf16 %v78_v12, %v77_v11  ;;  %v80_v15 = vld [vmem:[#allocation5 + $0xd8] sm:$0xff]  ;;  %v82_v18 = vld [vmem:[#allocation5 + $0xe8] sm:$0xff] }
  0x41   :  { %545 = vmatpush3.bf16.msra.mxu0 %v544_v4  ;;  %v84_v21 = vld [vmem:[#allocation5 + $0xf8] sm:$0xff]  ;;  %v86_v24 = vld [vmem:[#allocation5 + $0x108] sm:$0xff] }
  0x42   :  { %546 = vmatprep.subr.bf16.mxu0 %v681_v0 }
  0x43   :  { %527 = vmatpush3.bf16.msra.mxu1 %v526_v14  ;;  %v79_v14 = vld [vmem:[#allocation5 + $0xd0] sm:$0xff] }
  0x44   :  { %528 = vmatprep.subr.bf16.mxu1 %v681_v0  ;;  %v556_v16 = vpack.c.bf16 %v80_v15, %v79_v14 }
  0x45   :  { %548 = vmatpush3.bf16.msra.mxu0 %v547_v7 }
  0x46   :  { %549 = vmatprep.subr.bf16.mxu0 %v681_v0 }
  0x47   :  { %530 = vmatpush3.bf16.msra.mxu1 %v529_v17  ;;  %v81_v17 = vld [vmem:[#allocation5 + $0xe0] sm:$0xff] }
  0x48   :  { %531 = vmatprep.subr.bf16.mxu1 %v681_v0  ;;  %v559_v19 = vpack.c.bf16 %v82_v18, %v81_v17 }
  0x49   :  { %551 = vmatpush3.bf16.msra.mxu0 %v550_v10 }
  0x4a   :  { %552 = vmatprep.subr.bf16.mxu0 %v681_v0 }
  0x4b   :  { %533 = vmatpush3.bf16.msra.mxu1 %v532_v20  ;;  %v83_v20 = vld [vmem:[#allocation5 + $0xf0] sm:$0xff] }
  0x4c   :  { %534 = vmatprep.subr.bf16.mxu1 %v681_v0  ;;  %v562_v22 = vpack.c.bf16 %v84_v21, %v83_v20 }
  0x4d   :  { %554 = vmatpush3.bf16.msra.mxu0 %v553_v13 }
  0x4e   :  { %555 = vmatprep.subr.bf16.mxu0 %v681_v0 }
  0x4f   :  { %536 = vmatpush3.bf16.msra.mxu1 %v535_v23  ;;  %v85_v23 = vld [vmem:[#allocation5 + $0x100] sm:$0xff] }
  0x50   :  { %537 = vmatprep.subr.bf16.mxu1 %v681_v0  ;;  %v565_v25 = vpack.c.bf16 %v86_v24, %v85_v23 }
  0x51   :  { %557 = vmatpush3.bf16.msra.mxu0 %v556_v16 }
  0x52   :  { %558 = vmatprep.subr.bf16.mxu0 %v681_v0 }
  0x53   :  { %539 = vmatpush3.bf16.msra.mxu1 %v538_v27 }
  0x54   :  { %540 = vmatprep.subr.bf16.mxu1 %v681_v0 }
  0x55   :  { %560 = vmatpush3.bf16.msra.mxu0 %v559_v19 }
  0x56   :  { %561 = vmatprep.subr.bf16.mxu0 %v681_v0 }
  0x57   :  { %542 = vmatpush3.bf16.msra.mxu1 %v541_v29 }
  0x59   :  { %563 = vmatpush3.bf16.msra.mxu0 %v562_v22 }
  0x5a   :  { %564 = vmatprep.subr.bf16.mxu0 %v681_v0 }
  0x5d   :  { %566 = vmatpush3.bf16.msra.mxu0 %v565_v25 }
 0x110   :  { %v158_v30 = vpop.f32.mrb[0].mxu0 }
 0x111   :  { %v162_v31 = vrot.slane %v158_v30, 4  ;;  %v169_v32 = vmul.f32 %v158_v30, %v158_v30  ;;  %v445_v33 = vpop.f32.mrb[1].mxu0 }
 0x113   :  { %v163_v34 = vadd.f32 %v162_v31, %v158_v30  ;;  %v170_v35 = vrot.slane %v169_v32, 4 }
 0x115   :  { %v164_v36 = vrot.slane %v163_v34, 2  ;;  %v171_v37 = vadd.f32 %v170_v35, %v169_v32 }
 0x117   :  { %v165_v38 = vadd.f32 %v164_v36, %v163_v34  ;;  %v172_v39 = vrot.slane %v171_v37, 2 }
 0x119   :  { %v166_v40 = vrot.slane %v165_v38, 1  ;;  %v173_v41 = vadd.f32 %v172_v39, %v171_v37 }
 0x11b   :  { %v167_v42 = vadd.f32 %v166_v40, %v165_v38  ;;  %v174_v43 = vrot.slane %v173_v41, 1 }
 0x11d   :  { %v168_v44 = vmul.f32 0.125, %v167_v42  ;;  %v175_v45 = vadd.f32 %v174_v43, %v173_v41 }
 0x11f   :  { %v176_v46 = vmul.f32 0.125, %v175_v45  ;;  %v177_v47 = vmul.f32 %v168_v44, %v168_v44 }
 0x121   :  { %v178_v48 = vsub.f32 %v176_v46, %v177_v47  ;;  %v295_v47 = vsub.s32 2, %v751_v51 }
 0x123   :  { %v179_v49 = vadd.f32 1e-05, %v178_v48 }
 0x125   :  { %576 = vrsqrt.f32 %v179_v49 }
 0x12f   :  { %v577_v53 = vpop.eup %576 }
 0x130   :  { %v181_v54 = vmul.f32 %v577_v53, %v753_v52  ;;  %v300_v53 = vsub.s32 3, %v751_v51 }
 0x132   :  { %v182_v56 = vmul.f32 %v181_v54, %v168_v44  ;;  %v190_v57 = vrot.slane %v181_v54, %v189_v55 }
 0x134   :  { %v184_v58 = vrot.slane %v182_v56, 7  ;;  %v191_v61 = vmul.f32 %v190_v57, %v158_v30 }
 0x136   :  { %v186_v60 = vsub.f32 %v753_v52, %v184_v58 }
 0x138   :  { %v195_v62 = vrot.slane %v186_v60, %v194_v59  ;;  %v306_v59 = vsub.s32 4, %v751_v51 }
 0x13a   :  { %v196_v63 = vadd.f32 %v195_v62, %v191_v61  ;;  %v307_v60 = vrot.slane %v753_v52, %v306_v59 }
 0x13c   :  { %v197_v1 = vmax.f32 %v196_v63, 0.0 }
 0x13e   :  { %479 = vmatmul.mubr.f32.vlgmr.msra.gmra.mrb[0].mxu1 %v197_v1  ;;  %v381_v1 = vsub.s32 5, %v751_v51 }
 0x140   :  { %v382_v2 = vrot.slane %v753_v52, %v381_v1 }
 0x211   :  { %v264_v26 = vpop.f32.mrb[0].mxu1 }
 0x212   :  { %v268_v27 = vrot.slane %v264_v26, 4  ;;  %v275_v28 = vmul.f32 %v264_v26, %v264_v26  ;;  %v480_v29 = vpop.f32.mrb[1].mxu1 }
 0x214   :  { %v269_v30 = vadd.f32 %v268_v27, %v264_v26  ;;  %v276_v31 = vrot.slane %v275_v28, 4 }
 0x216   :  { %v270_v32 = vrot.slane %v269_v30, 2  ;;  %v277_v33 = vadd.f32 %v276_v31, %v275_v28 }
 0x218   :  { %v271_v34 = vadd.f32 %v270_v32, %v269_v30  ;;  %v278_v35 = vrot.slane %v277_v33, 2 }
 0x21a   :  { %v272_v36 = vrot.slane %v271_v34, 1  ;;  %v279_v37 = vadd.f32 %v278_v35, %v277_v33 }
 0x21c   :  { %v273_v38 = vadd.f32 %v272_v36, %v271_v34  ;;  %v280_v39 = vrot.slane %v279_v37, 1 }
 0x21e   :  { %v274_v40 = vmul.f32 0.125, %v273_v38  ;;  %v281_v0 = vadd.f32 %v280_v39, %v279_v37 }
 0x220   :  { %v282_v41 = vmul.f32 0.125, %v281_v0  ;;  %v283_v42 = vmul.f32 %v274_v40, %v274_v40 }
 0x222   :  { %v284_v43 = vsub.f32 %v282_v41, %v283_v42 }
 0x224   :  { %v285_v44 = vadd.f32 1e-05, %v284_v43 }
 0x226   :  { %578 = vrsqrt.f32 %v285_v44 }
 0x230   :  { %v579_v45 = vpop.eup %578 }
 0x231   :  { %v287_v46 = vmul.f32 %v579_v45, %v753_v52 }
 0x233   :  { %v288_v48 = vmul.f32 %v287_v46, %v274_v40  ;;  %v296_v50 = vrot.slane %v287_v46, %v295_v47 }
 0x235   :  { %v290_v49 = vrot.slane %v288_v48, 7  ;;  %v297_v55 = vmul.f32 %v296_v50, %v264_v26 }
 0x237   :  { %v292_v54 = vsub.f32 %v753_v52, %v290_v49 }
 0x239   :  { %v301_v56 = vrot.slane %v292_v54, %v300_v53 }
 0x23b   :  { %v302_v57 = vadd.f32 %v301_v56, %v297_v55 }
 0x23d   :  { %v303_v58 = vmax.f32 %v302_v57, 0.0 }
 0x23f   :  { %514 = vmatmul.mubr.f32.vlgmr.msra.gmra.mrb[2].mxu0 %v303_v58 }
 0x312   :  { %v374_v61 = vpop.f32.mrb[2].mxu0 }
 0x313   :  { %v375_v62 = vadd.f32 %v374_v61, %v307_v60  ;;  %v515_v63 = vpop.f32.mrb[3].mxu0 }
 0x315   :  { %580 = vtanh.f32 %v375_v62 }
 0x31f   :  { %v581_v3 = vpop.eup %580 }
 0x320   :  { %v383_v4 = vmul.f32 %v581_v3, %v382_v2 }
 0x322   :  { %384 = vst [vmem:[#allocation8] sm:$0xff] %v383_v4 }
 0x323   :  { %659 = shalt.err (!%p656_p0)
}
 0x324   :  { %s660_s25 = scalar_lea.hbm %s789_s3, 128 }
 0x325   :  { %p661_p1 = scmp.ne.s32.totalorder %s789_s3, %s660_s25  ;;  %p664_p2 = scmp.lt.u32.totalorder %s660_s25, %s789_s3 }
 0x327   :  { %p666_p3 = pnand %p664_p2, %p661_p1 }
 0x329   :  { %669 = shalt.err (!%p666_p3)
}
 0x32a   :  { %394 = dma.vmem_to_hbm [thread:$0]  %s392_s21, 128, %s789_s3, [#allocation4]  }
 0x32b   :  { %674 = dma.done.wait [#allocation4], 128  }
 0x32c   :  { %675 = vsyncadd [#allocation4], 4294967168 }
 0x32d   :  { %398 = vsyncpa [#allocation3], 1 }
 0x32e   :  { %399 = vsyncpa [#allocation6], 1 }
 0x32f   :  { %400 = vsyncpa [#allocation4], 1 }

</bundles_post_ra>
